<compile_context>
chip_gen: v5e
topology: v5e:2x2
jax: 0.10.0
libtpu: 0.0.40
codegen_flags: <defaults>
</compile_context>

<pallas_src>
import jax
import jax.numpy as jnp
from jax.experimental import pallas as pl
from jax.experimental.pallas import tpu as pltpu


def mlp_kernel(x_ref, w1_ref, b1_ref, w2_ref, b2_ref, out_ref):
    # In-kernel bf16 cast of x (VPU cast hides under load/MXU slots; avoids a
    # separate XLA cast op that would double the dominant x HBM traffic).
    x16 = x_ref[...].astype(jnp.bfloat16)

    # layer1: Linear(input_size -> hidden_size); bf16 MXU operands, f32 accum.
    h = jnp.dot(x16, w1_ref[...], preferred_element_type=jnp.float32)
    h = jnp.tanh(h + b1_ref[...])                       # f32 EUP tanh, (1,H) bcast

    # layer2: Linear(hidden_size -> output_size); re-quantize activation to
    # bf16 for the MXU, accumulate in f32.
    o = jnp.dot(h.astype(jnp.bfloat16), w2_ref[...],
                preferred_element_type=jnp.float32)
    o = o + b2_ref[...]                                  # (1, O) broadcasts

    # sigmoid(o) = 0.5 * tanh(0.5 * o) + 0.5  -> one EUP push, exact math,
    # the mul/add are VALU filler hidden under loads/MXU.
    out_ref[...] = (0.5 * jnp.tanh(0.5 * o) + 0.5).astype(out_ref.dtype)


def _pick_batch_tile(B, block_b):
    """Batch tile: whole batch if it fits, else a 16-aligned tile (bf16 packing)."""
    if block_b is None:
        block_b = 512          # large default: per-step overhead ~0.35us, so big tiles
    if block_b >= B:
        return B
    tb = max(16, (block_b // 16) * 16)
    return min(tb, B)


def mlp_forward(x, w1, b1, w2, b2, *, block_b=None):
    """x: (B, In) f32; w1: (In, H) bf16; b1: (1, H) f32; w2: (H, O) bf16; b2: (1, O) f32."""
    B, In = x.shape
    H = w1.shape[1]
    O = w2.shape[1]

    tb = _pick_batch_tile(B, block_b)
    grid = (pl.cdiv(B, tb),)

    # Rough VMEM need (double-buffered x/out tiles + resident weights/biases),
    # with headroom; clamp to stay within v7x's 64 MiB physical VMEM per TC.
    est = 2 * (tb * In * 4 + tb * O * 2) + 2 * (In * H * 2 + H * 2 + H * O * 2 + O * 2)
    vmem_limit = int(min(max(2 * est, 32 * 1024 * 1024), 60 * 1024 * 1024))

    return pl.pallas_call(
        mlp_kernel,
        out_shape=jax.ShapeDtypeStruct((B, O), jnp.bfloat16),
        grid_spec=pl.GridSpec(
            grid=grid,
            in_specs=[
                # x: tiled along batch, pipelined per grid step (f32 in HBM).
                pl.BlockSpec((tb, In), lambda i: (i, 0)),
                # Weights / biases: whole array, constant index_map -> VMEM-resident.
                pl.BlockSpec((In, H), lambda i: (0, 0)),
                pl.BlockSpec((1, H), lambda i: (0, 0)),
                pl.BlockSpec((H, O), lambda i: (0, 0)),
                pl.BlockSpec((1, O), lambda i: (0, 0)),
            ],
            out_specs=pl.BlockSpec((tb, O), lambda i: (i, 0)),
        ),
        compiler_params=pltpu.CompilerParams(
            dimension_semantics=("parallel",),
            vmem_limit_bytes=vmem_limit,
        ),
    )(x, w1, b1, w2, b2)


def init_params(key, input_size, hidden_size, output_size):
    """Deterministic init mimicking nn.Linear's U(-1/sqrt(fan_in), 1/sqrt(fan_in)).

    Weights are stored transposed to (in, out) and cached as bf16 once here
    (no per-forward re-cast); biases stay f32 (added to the f32 accumulator).
    """
    k1, k2, k3, k4 = jax.random.split(key, 4)
    bound1 = 1.0 / jnp.sqrt(input_size)
    bound2 = 1.0 / jnp.sqrt(hidden_size)
    w1 = jax.random.uniform(k1, (input_size, hidden_size), jnp.float32,
                            -bound1, bound1)
    b1 = jax.random.uniform(k2, (1, hidden_size), jnp.float32, -bound1, bound1)
    w2 = jax.random.uniform(k3, (hidden_size, output_size), jnp.float32,
                            -bound2, bound2)
    b2 = jax.random.uniform(k4, (1, output_size), jnp.float32, -bound2, bound2)
    return w1, b1, w2, b2


def reference_forward(x, w1_f32, b1, w2_f32, b2):
    h = jnp.tanh(x @ w1_f32 + b1)
    return jax.nn.sigmoid(h @ w2_f32 + b2)


if __name__ == "__main__":
    input_size, hidden_size, output_size = 16, 32, 8
    batch = 64            # tb = B -> single grid step, zero pipeline overhead

    key = jax.random.PRNGKey(0)
    kx, kp = jax.random.split(key)
    x = jax.random.normal(kx, (batch, input_size), jnp.float32)
    w1_f32, b1, w2_f32, b2 = init_params(kp, input_size, hidden_size, output_size)

    # Cache bf16 MXU weights once (outside the forward path).
    w1 = w1_f32.astype(jnp.bfloat16)
    w2 = w2_f32.astype(jnp.bfloat16)

    out = mlp_forward(x, w1, b1, w2, b2)
    jax.block_until_ready(out)

    # f32 reference; relaxed tolerance covers bf16 MXU operands + bf16 output.
    ref = reference_forward(x, w1_f32, b1, w2_f32, b2)
    assert out.shape == (batch, output_size)
    assert out.dtype == jnp.bfloat16
    err = float(jnp.max(jnp.abs(out.astype(jnp.float32) - ref)))
    assert err < 2e-2, err

    # predict() semantics (threshold at 0.5 -> int), done as glue in plain JAX.
    _ = (out > 0.5).astype(jnp.int32)

    print("KERNEL_OK")
</pallas_src>

<mosaic_0001>
module attributes {stable_mosaic.version = 11 : i64} {
  func.func @mlp_kernel(%arg0: i32, %arg1: memref<64x16xf32, #tpu.memory_space<vmem>>, %arg2: memref<16x32xbf16, #tpu.memory_space<vmem>>, %arg3: memref<1x32xf32, #tpu.memory_space<vmem>>, %arg4: memref<32x8xbf16, #tpu.memory_space<vmem>>, %arg5: memref<1x8xf32, #tpu.memory_space<vmem>>, %arg6: memref<64x8xbf16, #tpu.memory_space<vmem>>) attributes {dimension_semantics = [#tpu.dimension_semantics<parallel>], iteration_bounds = array<i64: 1>, scalar_prefetch = 0 : i64, scratch_operands = 0 : i64, tpu.core_type = #tpu.core_type<tc>, window_params = [{transform_indices = @transform_0, window_bounds = array<i64: 64, 16>}, {pipeline_mode = #tpu.pipeline_mode<synchronous>, transform_indices = @transform_1, window_bounds = array<i64: 16, 32>}, {pipeline_mode = #tpu.pipeline_mode<synchronous>, transform_indices = @transform_2, window_bounds = array<i64: 1, 32>}, {pipeline_mode = #tpu.pipeline_mode<synchronous>, transform_indices = @transform_3, window_bounds = array<i64: 32, 8>}, {pipeline_mode = #tpu.pipeline_mode<synchronous>, transform_indices = @transform_4, window_bounds = array<i64: 1, 8>}, {transform_indices = @transform_5, window_bounds = array<i64: 64, 8>}]} {
    %c0 = arith.constant 0 : index
    %c0_0 = arith.constant 0 : index
    %0 = vector.load %arg1[%c0, %c0_0] : memref<64x16xf32, #tpu.memory_space<vmem>>, vector<64x16xf32>
    %1 = arith.truncf %0 : vector<64x16xf32> to vector<64x16xbf16>
    %c0_1 = arith.constant 0 : index
    %c0_2 = arith.constant 0 : index
    %2 = vector.load %arg2[%c0_1, %c0_2] : memref<16x32xbf16, #tpu.memory_space<vmem>>, vector<16x32xbf16>
    %cst = arith.constant dense<0.000000e+00> : vector<64x32xf32>
    %3 = tpu.matmul %1, %2, %cst {dimension_numbers = #tpu.dot_dimension_numbers<[1], [0], [0], [1], [0, 0, 1, 1], [], []>} : vector<64x16xbf16>, vector<16x32xbf16>, vector<64x32xf32> -> vector<64x32xf32>
    %c0_3 = arith.constant 0 : index
    %c0_4 = arith.constant 0 : index
    %4 = vector.load %arg3[%c0_3, %c0_4] : memref<1x32xf32, #tpu.memory_space<vmem>>, vector<1x32xf32>
    %5 = vector.broadcast %4 : vector<1x32xf32> to vector<64x32xf32>
    %6 = arith.addf %3, %5 : vector<64x32xf32>
    %7 = math.tanh %6 : vector<64x32xf32>
    %8 = arith.truncf %7 : vector<64x32xf32> to vector<64x32xbf16>
    %c0_5 = arith.constant 0 : index
    %c0_6 = arith.constant 0 : index
    %9 = vector.load %arg4[%c0_5, %c0_6] : memref<32x8xbf16, #tpu.memory_space<vmem>>, vector<32x8xbf16>
    %cst_7 = arith.constant dense<0.000000e+00> : vector<64x8xf32>
    %10 = tpu.matmul %8, %9, %cst_7 {dimension_numbers = #tpu.dot_dimension_numbers<[1], [0], [0], [1], [0, 0, 1, 1], [], []>} : vector<64x32xbf16>, vector<32x8xbf16>, vector<64x8xf32> -> vector<64x8xf32>
    %c0_8 = arith.constant 0 : index
    %c0_9 = arith.constant 0 : index
    %11 = vector.load %arg5[%c0_8, %c0_9] : memref<1x8xf32, #tpu.memory_space<vmem>>, vector<1x8xf32>
    %12 = vector.broadcast %11 : vector<1x8xf32> to vector<64x8xf32>
    %13 = arith.addf %10, %12 : vector<64x8xf32>
    %cst_10 = arith.constant 5.000000e-01 : f32
    %14 = vector.broadcast %cst_10 : f32 to vector<64x8xf32>
    %15 = arith.mulf %14, %13 : vector<64x8xf32>
    %16 = math.tanh %15 : vector<64x8xf32>
    %cst_11 = arith.constant 5.000000e-01 : f32
    %17 = vector.broadcast %cst_11 : f32 to vector<64x8xf32>
    %18 = arith.mulf %17, %16 : vector<64x8xf32>
    %cst_12 = arith.constant 5.000000e-01 : f32
    %19 = vector.broadcast %cst_12 : f32 to vector<64x8xf32>
    %20 = arith.addf %18, %19 : vector<64x8xf32>
    %21 = arith.truncf %20 : vector<64x8xf32> to vector<64x8xbf16>
    %c0_13 = arith.constant 0 : index
    %c0_14 = arith.constant 0 : index
    %22 = vector.load %arg6[%c0_13, %c0_14] : memref<64x8xbf16, #tpu.memory_space<vmem>>, vector<64x8xbf16>
    tpu.vector_store %arg6[%c0_13, %c0_14], %21 {strides = array<i32>} : memref<64x8xbf16, #tpu.memory_space<vmem>>, vector<64x8xbf16>,
    return
  }
  func.func @transform_0(%arg0: i32) -> (i32, i32) {
    %c0_i32 = arith.constant 0 : i32
    %c0_i32_0 = arith.constant 0 : i32
    return %arg0, %c0_i32 : i32, i32
  }
  func.func @transform_1(%arg0: i32) -> (i32, i32) {
    %c0_i32 = arith.constant 0 : i32
    %c0_i32_0 = arith.constant 0 : i32
    %c0_i32_1 = arith.constant 0 : i32
    return %c0_i32, %c0_i32_0 : i32, i32
  }
  func.func @transform_2(%arg0: i32) -> (i32, i32) {
    %c0_i32 = arith.constant 0 : i32
    %c0_i32_0 = arith.constant 0 : i32
    %c0_i32_1 = arith.constant 0 : i32
    return %c0_i32, %c0_i32_0 : i32, i32
  }
  func.func @transform_3(%arg0: i32) -> (i32, i32) {
    %c0_i32 = arith.constant 0 : i32
    %c0_i32_0 = arith.constant 0 : i32
    %c0_i32_1 = arith.constant 0 : i32
    return %c0_i32, %c0_i32_0 : i32, i32
  }
  func.func @transform_4(%arg0: i32) -> (i32, i32) {
    %c0_i32 = arith.constant 0 : i32
    %c0_i32_0 = arith.constant 0 : i32
    %c0_i32_1 = arith.constant 0 : i32
    return %c0_i32, %c0_i32_0 : i32, i32
  }
  func.func @transform_5(%arg0: i32) -> (i32, i32) {
    %c0_i32 = arith.constant 0 : i32
    %c0_i32_0 = arith.constant 0 : i32
    return %arg0, %c0_i32 : i32, i32
  }
}

</mosaic_0001>

<bundles_post_ra>
// kernel: tpu_custom_call.1
= control target key start
LH: loop header
LB: loop body
LE: loop exit
PB: predicated region body
PF: predicated region fallthrough
CT: control target
= control target key end

     0   :  { %vm45_vm0 = vcmask 130048   ;;  %vm119_vm1 = vcmask 261120   ;;  %vm201_vm2 = vcmask 60416   ;;  %s379_s1 = inlined_call_operand.vmem [shape: bf16[16,32], index: 1, kind: input, shape index: {}]   ;;  %s380_s0 = inlined_call_operand.vmem [shape: f32[64,16], index: 0, kind: input, shape index: {}]   ;;  %s381_s2 = inlined_call_operand.vmem [shape: f32[1,32], index: 2, kind: input, shape index: {}]   ;;  %s382_s4 = inlined_call_operand.vmem [shape: f32[1,8], index: 4, kind: input, shape index: {}]   ;;  %s383_s3 = inlined_call_operand.vmem [shape: bf16[32,8], index: 3, kind: input, shape index: {}]   ;;  %s384_s5 = inlined_call_operand.vmem [shape: bf16[64,8], index: 5, kind: output, shape index: {}]  }
   0x1   :  { %v234_v0 = vld [vmem:[%s379_s1] sm:$0xff]  ;;  %v22_v2 = vld [vmem:[%s380_s0 + $0x8] sm:$0xff]  ;;  %v23_v4 = vld [vmem:[%s380_s0 + $0x10] sm:$0xff] }
   0x2   :  { %v21_v1 = vld [vmem:[%s380_s0] sm:$0xff]  ;;  %v24_v5 = vld [vmem:[%s380_s0 + $0x18] sm:$0xff]  ;;  %65 = vmatpush.bf16.msra.mxu0 %v234_v0  ;;  %237 = vmatpush.bf16.msra.mxu3 %v234_v0  ;;  %v26_v8 = vld [vmem:[%s380_s0 + $0x28] sm:$0xff] }
   0x3   :  { %v29_v3 = vpack.c.bf16 %v22_v2, %v21_v1  ;;  %v30_v6 = vpack.c.bf16 %v24_v5, %v23_v4  ;;  %v25_v7 = vld [vmem:[%s380_s0 + $0x20] sm:$0xff]  ;;  %v27_v10 = vld [vmem:[%s380_s0 + $0x30] sm:$0xff]  ;;  %v28_v11 = vld [vmem:[%s380_s0 + $0x38] sm:$0xff] }
   0x4   :  { %v31_v9 = vpack.c.bf16 %v26_v8, %v25_v7  ;;  %v32_v12 = vpack.c.bf16 %v28_v11, %v27_v10  ;;  %v236_v13 = vld [vmem:[%s383_s3 + $0x8] sm:$0xff]  ;;  %v235_v14 = vld [vmem:[%s383_s3] sm:$0xff] }
   0x5   :  { %218 = vmatmul.msk.bf16.vlgmr.msra.gmra.mxu0 %vm45_vm0, %v29_v3  ;;  %219 = vmatmul.msk.bf16.vlgmr.msra.gmra.mxu3 %vm45_vm0, %v30_v6  ;;  %v240_v16 = vld [vmem:[%s381_s2] ss:$0 sm:$0xff] }
   0x6   :  { %138 = vmatpush.bf16.msra.mxu1 %v236_v13  ;;  %238 = vmatpush.bf16.msra.mxu2 %v236_v13  ;;  %v241_v44 = vld [vmem:[%s382_s4] ss:$0 sm:$0xff] }
   0xa   :  { %139 = vmatpush.bf16.msra.mxu1 %v235_v14  ;;  %239 = vmatpush.bf16.msra.mxu2 %v235_v14 }
  0x15   :  { %220 = vmatmul.msk.bf16.gmra.mxu3 %vm45_vm0, %v31_v9 }
  0x25   :  { %221 = vmatmul.msk.bf16.gmra.mxu3 %vm45_vm0, %v32_v12 }
  0x82   :  { %v67_v15 = vpop.f32.mrf.mxu0 }
  0x83   :  { %v68_v17 = vadd.f32 %v240_v16, %v67_v15 }
  0x85   :  { %242 = vtanh.f32 %v68_v17 }
  0x88   :  { %v72_v18 = vpop.f32.mrf.mxu3 }
  0x89   :  { %v73_v27 = vadd.f32 %v240_v16, %v72_v18 }
  0x8a   :  { %v69_v19 = vpop.f32.mrf.mxu0 }
  0x8b   :  { %v70_v20 = vadd.f32 %v240_v16, %v69_v19  ;;  %v243_v22 = vpop.eup %242 }
  0x8d   :  { %244 = vtanh.f32 %v70_v20 }
  0x90   :  { %v74_v21 = vpop.f32.mrf.mxu3 }
  0x91   :  { %v75_v25 = vadd.f32 %v240_v16, %v74_v21 }
  0x93   :  { %v245_v23 = vpop.eup %244  ;;  %246 = vtanh.f32 %v75_v25 }
  0x94   :  { %v95_v24 = vpack.c.bf16 %v245_v23, %v243_v22  ;;  %248 = vtanh.f32 %v73_v27 }
  0x96   :  { %230 = vmatmul.msk.bf16.vlgmr.msra.gmra.mxu1 %vm119_vm1, %v95_v24 }
  0x98   :  { %v77_v26 = vpop.f32.mrf.mxu3 }
  0x99   :  { %v78_v28 = vadd.f32 %v240_v16, %v77_v26  ;;  %v247_v30 = vpop.eup %246 }
  0x9a   :  { %v249_v32 = vpop.eup %248 }
  0x9b   :  { %250 = vtanh.f32 %v78_v28  ;;  %v96_v33 = vpack.c.bf16 %v247_v30, %v249_v32 }
  0xa0   :  { %v79_v29 = vpop.f32.mrf.mxu3 }
  0xa1   :  { %v80_v31 = vadd.f32 %v240_v16, %v79_v29  ;;  %v251_v34 = vpop.eup %250 }
  0xa3   :  { %252 = vtanh.f32 %v80_v31 }
  0xa6   :  { %231 = vmatmul.msk.bf16.gmra.mxu1 %vm119_vm1, %v96_v33 }
  0xa8   :  { %v82_v35 = vpop.f32.mrf.mxu3 }
  0xa9   :  { %v253_v36 = vpop.eup %252  ;;  %v83_v38 = vadd.f32 %v240_v16, %v82_v35 }
  0xaa   :  { %v97_v37 = vpack.c.bf16 %v253_v36, %v251_v34 }
  0xab   :  { %254 = vtanh.f32 %v83_v38 }
  0xac   :  { %232 = vmatmul.msk.bf16.vlgmr.msra.gmra.mxu2 %vm119_vm1, %v97_v37 }
  0xb0   :  { %v84_v39 = vpop.f32.mrf.mxu3 }
  0xb1   :  { %v85_v40 = vadd.f32 %v240_v16, %v84_v39  ;;  %v255_v41 = vpop.eup %254 }
  0xb3   :  { %256 = vtanh.f32 %v85_v40 }
  0xb9   :  { %v257_v42 = vpop.eup %256 }
  0xba   :  { %v98_v43 = vpack.c.bf16 %v257_v42, %v255_v41 }
  0xbc   :  { %233 = vmatmul.msk.bf16.gmra.mxu2 %vm119_vm1, %v98_v43 }
 0x113   :  { %v141_v45 = vpop.f32.mrf.mxu1 }
 0x114   :  { %v142_v46 = vadd.f32 %v241_v44, %v141_v45 }
 0x116   :  { %v161_v47 = vmul.f32 0.5, %v142_v46 }
 0x118   :  { %258 = vtanh.f32 %v161_v47 }
 0x11b   :  { %v143_v48 = vpop.f32.mrf.mxu1 }
 0x11c   :  { %v144_v49 = vadd.f32 %v241_v44, %v143_v48 }
 0x11e   :  { %v259_v50 = vpop.eup %258  ;;  %v162_v51 = vmul.f32 0.5, %v144_v49 }
 0x11f   :  { %v177_v52 = vmul.f32 0.5, %v259_v50 }
 0x120   :  { %260 = vtanh.f32 %v162_v51 }
 0x121   :  { %v185_v53 = vadd.f32 0.5, %v177_v52 }
 0x123   :  { %v193_v54 = vpack.c.bf16 %v185_v53, %v185_v53  ;;  %v146_v55 = vpop.f32.mrf.mxu1 }
 0x124   :  { %v147_v56 = vadd.f32 %v241_v44, %v146_v55 }
 0x125   :  { %202 = vst.msk [vmem:[%s384_s5] sm:$0xf] %vm201_vm2, %v193_v54 }
 0x126   :  { %v261_v57 = vpop.eup %260  ;;  %v163_v58 = vmul.f32 0.5, %v147_v56 }
 0x127   :  { %v178_v59 = vmul.f32 0.5, %v261_v57 }
 0x128   :  { %262 = vtanh.f32 %v163_v58 }
 0x129   :  { %v186_v60 = vadd.f32 0.5, %v178_v59 }
 0x12b   :  { %v194_v61 = vpack.c.bf16 %v186_v60, %v186_v60  ;;  %v148_v62 = vpop.f32.mrf.mxu1 }
 0x12c   :  { %v149_v63 = vadd.f32 %v241_v44, %v148_v62 }
 0x12d   :  { %203 = vst.msk [vmem:[%s384_s5 + $0x4] sm:$0xf] %vm201_vm2, %v194_v61 }
 0x12e   :  { %v263_v0 = vpop.eup %262  ;;  %v164_v1 = vmul.f32 0.5, %v149_v63 }
 0x12f   :  { %v179_v2 = vmul.f32 0.5, %v263_v0  ;;  %v151_v3 = vpop.f32.mrf.mxu2 }
 0x130   :  { %264 = vtanh.f32 %v164_v1  ;;  %v152_v4 = vadd.f32 %v241_v44, %v151_v3 }
 0x131   :  { %v187_v5 = vadd.f32 0.5, %v179_v2 }
 0x132   :  { %v165_v6 = vmul.f32 0.5, %v152_v4 }
 0x133   :  { %v195_v7 = vpack.c.bf16 %v187_v5, %v187_v5 }
 0x134   :  { %266 = vtanh.f32 %v165_v6 }
 0x135   :  { %204 = vst.msk [vmem:[%s384_s5 + $0x8] sm:$0xf] %vm201_vm2, %v195_v7 }
 0x136   :  { %v265_v8 = vpop.eup %264 }
 0x137   :  { %v180_v9 = vmul.f32 0.5, %v265_v8  ;;  %v153_v10 = vpop.f32.mrf.mxu2 }
 0x138   :  { %v154_v11 = vadd.f32 %v241_v44, %v153_v10 }
 0x139   :  { %v188_v12 = vadd.f32 0.5, %v180_v9 }
 0x13a   :  { %v267_v13 = vpop.eup %266  ;;  %v166_v14 = vmul.f32 0.5, %v154_v11 }
 0x13b   :  { %v196_v15 = vpack.c.bf16 %v188_v12, %v188_v12  ;;  %v181_v16 = vmul.f32 0.5, %v267_v13 }
 0x13c   :  { %268 = vtanh.f32 %v166_v14 }
 0x13d   :  { %205 = vst.msk [vmem:[%s384_s5 + $0xc] sm:$0xf] %vm201_vm2, %v196_v15  ;;  %v189_v17 = vadd.f32 0.5, %v181_v16 }
 0x13f   :  { %v197_v18 = vpack.c.bf16 %v189_v17, %v189_v17  ;;  %v156_v19 = vpop.f32.mrf.mxu2 }
 0x140   :  { %v157_v20 = vadd.f32 %v241_v44, %v156_v19 }
 0x141   :  { %206 = vst.msk [vmem:[%s384_s5 + $0x10] sm:$0xf] %vm201_vm2, %v197_v18 }
 0x142   :  { %v269_v21 = vpop.eup %268  ;;  %v167_v22 = vmul.f32 0.5, %v157_v20 }
 0x143   :  { %v182_v23 = vmul.f32 0.5, %v269_v21 }
 0x144   :  { %270 = vtanh.f32 %v167_v22 }
 0x145   :  { %v190_v24 = vadd.f32 0.5, %v182_v23 }
 0x147   :  { %v198_v25 = vpack.c.bf16 %v190_v24, %v190_v24  ;;  %v158_v26 = vpop.f32.mrf.mxu2 }
 0x148   :  { %v159_v27 = vadd.f32 %v241_v44, %v158_v26 }
 0x149   :  { %207 = vst.msk [vmem:[%s384_s5 + $0x14] sm:$0xf] %vm201_vm2, %v198_v25 }
 0x14a   :  { %v271_v28 = vpop.eup %270  ;;  %v168_v29 = vmul.f32 0.5, %v159_v27 }
 0x14b   :  { %v183_v30 = vmul.f32 0.5, %v271_v28 }
 0x14c   :  { %272 = vtanh.f32 %v168_v29 }
 0x14d   :  { %v191_v31 = vadd.f32 0.5, %v183_v30 }
 0x14f   :  { %v199_v32 = vpack.c.bf16 %v191_v31, %v191_v31 }
 0x151   :  { %208 = vst.msk [vmem:[%s384_s5 + $0x18] sm:$0xf] %vm201_vm2, %v199_v32 }
 0x152   :  { %v273_v33 = vpop.eup %272 }
 0x153   :  { %v184_v34 = vmul.f32 0.5, %v273_v33 }
 0x155   :  { %v192_v35 = vadd.f32 0.5, %v184_v34 }
 0x157   :  { %v200_v36 = vpack.c.bf16 %v192_v35, %v192_v35 }
 0x159   :  { %209 = vst.msk [vmem:[%s384_s5 + $0x1c] sm:$0xf] %vm201_vm2, %v200_v36 }

</bundles_post_ra>
